<compile_context>
chip_gen: v5e
topology: v5e:2x2
jax: 0.10.0
libtpu: 0.0.40
codegen_flags: <defaults>
</compile_context>

<pallas_src>
import functools

import jax
import jax.numpy as jnp
from jax import lax
from jax.experimental import pallas as pl
from jax.experimental.pallas import tpu as pltpu


_VMEM_LIMIT = 32 * 1024 * 1024


# ----------------------------- tiling helpers -------------------------------


def _pick_tile(dim, target, align):
    """Largest multiple of `align` <= target that divides `dim`, else full dim."""
    if dim <= target:
        return dim
    t = (target // align) * align
    while t >= align:
        if dim % t == 0:
            return t
        t -= align
    return dim


def _head_group(heads, dim_head):
    """Smallest head group G with lane-dense G*dim_head (multiple of 128)."""
    for g in range(1, heads + 1):
        if heads % g == 0 and (g * dim_head) % 128 == 0:
            return g
    return heads  # tiny-model fallback: block becomes the full h*dh extent


# ----------------------------- linear kernels -------------------------------


def _matmul_kernel(x_ref, w_ref, o_ref, acc_ref):
    # x: (tm, tk), w: (tk, tn) (pre-transposed weight) -> o = x @ w
    @pl.when(pl.program_id(2) == 0)
    def _init():
        acc_ref[...] = jnp.zeros_like(acc_ref)

    acc_ref[...] += jnp.dot(
        x_ref[...].astype(jnp.bfloat16),
        w_ref[...].astype(jnp.bfloat16),
        preferred_element_type=jnp.float32,
    )

    @pl.when(pl.program_id(2) == pl.num_programs(2) - 1)
    def _fin():
        o_ref[...] = acc_ref[...].astype(o_ref.dtype)


def _matmul_bias_kernel(x_ref, w_ref, b_ref, o_ref, acc_ref):
    @pl.when(pl.program_id(2) == 0)
    def _init():
        acc_ref[...] = jnp.zeros_like(acc_ref)

    acc_ref[...] += jnp.dot(
        x_ref[...].astype(jnp.bfloat16),
        w_ref[...].astype(jnp.bfloat16),
        preferred_element_type=jnp.float32,
    )

    @pl.when(pl.program_id(2) == pl.num_programs(2) - 1)
    def _fin():
        o_ref[...] = (acc_ref[...] + b_ref[...].astype(jnp.float32)).astype(o_ref.dtype)


def pallas_linear(x2d, w_t, bias=None, *, out_dtype=None,
                  tm_target=512, tn_target=512, tk_target=512):
    """x2d: (M, K); w_t: (K, Nout) pre-transposed bf16 weight; bias: (Nout,)|None."""
    M, K = x2d.shape
    K2, Nout = w_t.shape
    assert K == K2
    out_dtype = x2d.dtype if out_dtype is None else out_dtype

    # Row tiling: pad M up rather than degrading to tiny row tiles.
    if M <= tm_target:
        tm, Mp, x_in = M, M, x2d
    else:
        tm = tm_target
        Mp = pl.cdiv(M, tm) * tm
        x_in = x2d if Mp == M else jnp.pad(x2d, ((0, Mp - M), (0, 0)))

    tn = _pick_tile(Nout, tn_target, 128)   # lane-dense output tiles
    tk = _pick_tile(K, tk_target, 128)
    grid = (Mp // tm, Nout // tn, K // tk)  # reduction axis last

    x_spec = pl.BlockSpec((tm, tk), lambda i, j, kk: (i, kk))
    w_spec = pl.BlockSpec((tk, tn), lambda i, j, kk: (kk, j))
    o_spec = pl.BlockSpec((tm, tn), lambda i, j, kk: (i, j))
    scratch = [pltpu.VMEM((tm, tn), jnp.float32)]
    cparams = pltpu.CompilerParams(
        dimension_semantics=("parallel", "parallel", "arbitrary"),
        vmem_limit_bytes=_VMEM_LIMIT,
    )
    cost = pl.CostEstimate(
        flops=2 * Mp * K * Nout,
        transcendentals=0,
        bytes_accessed=(Mp * K * x_in.dtype.itemsize
                        + K * Nout * w_t.dtype.itemsize
                        + Mp * Nout * jnp.dtype(out_dtype).itemsize),
    )

    if bias is None:
        out = pl.pallas_call(
            _matmul_kernel,
            out_shape=jax.ShapeDtypeStruct((Mp, Nout), out_dtype),
            grid_spec=pltpu.PrefetchScalarGridSpec(
                num_scalar_prefetch=0,
                grid=grid,
                in_specs=[x_spec, w_spec],
                out_specs=o_spec,
                scratch_shapes=scratch,
            ),
            compiler_params=cparams,
            cost_estimate=cost,
        )(x_in, w_t)
    else:
        b2d = bias.reshape(1, Nout)
        b_spec = pl.BlockSpec((1, tn), lambda i, j, kk: (0, j))
        out = pl.pallas_call(
            _matmul_bias_kernel,
            out_shape=jax.ShapeDtypeStruct((Mp, Nout), out_dtype),
            grid_spec=pltpu.PrefetchScalarGridSpec(
                num_scalar_prefetch=0,
                grid=grid,
                in_specs=[x_spec, w_spec, b_spec],
                out_specs=o_spec,
                scratch_shapes=scratch,
            ),
            compiler_params=cparams,
            cost_estimate=cost,
        )(x_in, w_t, b2d)

    return out if Mp == M else out[:M]


# ----------------------------- attention kernels -----------------------------


def _attn_single_kv_kernel(q_ref, k_ref, v_ref, o_ref, *, dh, g_heads):
    """Whole context in one KV tile: plain (numerically stable) softmax."""
    q = q_ref[...]        # (tq, G*dh) bf16
    k = k_ref[...]        # (Nk, G*dh) bf16
    v = v_ref[...]        # (Nk, G*dh) bf16
    outs = []
    for g in range(g_heads):
        sl = slice(g * dh, (g + 1) * dh)
        s = lax.dot_general(q[:, sl], k[:, sl], (((1,), (1,)), ((), ())),
                            preferred_element_type=jnp.float32)     # (tq, Nk)
        s = s - s.max(axis=-1, keepdims=True)
        p = jnp.exp(s)
        denom = p.sum(axis=-1, keepdims=True)
        o_g = jnp.dot(p.astype(v.dtype), v[:, sl],
                      preferred_element_type=jnp.float32)            # (tq, dh)
        outs.append(o_g * pl.reciprocal(denom, approx=True))
    o_ref[...] = jnp.concatenate(outs, axis=-1).astype(o_ref.dtype)


def _flash_attn_kernel(q_ref, k_ref, v_ref, o_ref, m_sc, l_sc, acc_sc, *, dh, g_heads):
    """Online-softmax flash attention over the KV (last, 'arbitrary') grid axis."""
    kv_step = pl.program_id(3)

    @pl.when(kv_step == 0)
    def _init():
        m_sc[...] = jnp.full(m_sc.shape, -jnp.inf, dtype=m_sc.dtype)
        l_sc[...] = jnp.zeros_like(l_sc)
        acc_sc[...] = jnp.zeros_like(acc_sc)

    q = q_ref[...]        # (tq, G*dh) bf16 (scale already folded into w_q)
    k = k_ref[...]        # (tk, G*dh) bf16
    v = v_ref[...]        # (tk, G*dh) bf16
    for g in range(g_heads):
        sl = slice(g * dh, (g + 1) * dh)
        s = lax.dot_general(q[:, sl], k[:, sl], (((1,), (1,)), ((), ())),
                            preferred_element_type=jnp.float32)     # (tq, tk)
        m_prev = m_sc[g]
        m_new = jnp.maximum(m_prev, s.max(axis=-1, keepdims=True))
        alpha = jnp.exp(m_prev - m_new)
        p = jnp.exp(s - m_new)
        l_sc[g] = alpha * l_sc[g] + p.sum(axis=-1, keepdims=True)
        acc_sc[g] = alpha * acc_sc[g] + jnp.dot(
            p.astype(v.dtype), v[:, sl], preferred_element_type=jnp.float32)
        m_sc[g] = m_new

    @pl.when(kv_step == pl.num_programs(3) - 1)
    def _fin():
        outs = [acc_sc[g] * pl.reciprocal(l_sc[g], approx=True)
                for g in range(g_heads)]
        o_ref[...] = jnp.concatenate(outs, axis=-1).astype(o_ref.dtype)


def pallas_cross_attention(q, kv, *, heads, dim_head,
                           tq_target=256, tk_target=256):
    """q: (b, Nq, h*dh); kv: (b, Nk, 2*h*dh) packed [K | V] -> (b, Nq, h*dh)."""
    b, nq, inner = q.shape
    bk, nk, kv_dim = kv.shape
    dh = dim_head
    assert bk == b and inner == heads * dh and kv_dim == 2 * inner

    G = _head_group(heads, dh)
    hg = heads // G
    gdh = G * dh

    fused = (gdh % 128 == 0)
    if fused:
        # Block straight into the fused KV buffer: K half is blocks [0, hg),
        # V half is blocks [hg, 2*hg) along the last dim.
        k_in, v_in, v_off = kv, kv, hg
    else:
        # Tiny-model fallback (G == heads, not lane aligned inside kv): split once.
        k_in, v_in, v_off = kv[:, :, :inner], kv[:, :, inner:], 0

    tq = _pick_tile(nq, tq_target, 16)
    tk = _pick_tile(nk, tk_target, 128)
    nqt, nkt = nq // tq, nk // tk

    cost = pl.CostEstimate(
        flops=4 * b * heads * nq * nk * dh,
        transcendentals=b * heads * nq * nk,
        bytes_accessed=(2 * q.size * q.dtype.itemsize
                        + kv.size * kv.dtype.itemsize),
    )

    if nkt == 1:
        # Single KV tile (e.g. 77-token CLIP context): no online rescale needed.
        kern = functools.partial(_attn_single_kv_kernel, dh=dh, g_heads=G)
        return pl.pallas_call(
            kern,
            out_shape=jax.ShapeDtypeStruct((b, nq, inner), q.dtype),
            grid_spec=pltpu.PrefetchScalarGridSpec(
                num_scalar_prefetch=0,
                grid=(b, hg, nqt),
                in_specs=[
                    pl.BlockSpec((None, tq, gdh), lambda bi, gi, qi: (bi, qi, gi)),
                    pl.BlockSpec((None, tk, gdh), lambda bi, gi, qi: (bi, 0, gi)),
                    pl.BlockSpec((None, tk, gdh),
                                 lambda bi, gi, qi: (bi, 0, v_off + gi)),
                ],
                out_specs=pl.BlockSpec((None, tq, gdh),
                                       lambda bi, gi, qi: (bi, qi, gi)),
            ),
            compiler_params=pltpu.CompilerParams(
                dimension_semantics=("parallel", "parallel", "parallel"),
                vmem_limit_bytes=_VMEM_LIMIT,
            ),
            cost_estimate=cost,
        )(q, k_in, v_in)

    kern = functools.partial(_flash_attn_kernel, dh=dh, g_heads=G)
    return pl.pallas_call(
        kern,
        out_shape=jax.ShapeDtypeStruct((b, nq, inner), q.dtype),
        grid_spec=pltpu.PrefetchScalarGridSpec(
            num_scalar_prefetch=0,
            grid=(b, hg, nqt, nkt),  # KV reduction axis last
            in_specs=[
                pl.BlockSpec((None, tq, gdh), lambda bi, gi, qi, ki: (bi, qi, gi)),
                pl.BlockSpec((None, tk, gdh), lambda bi, gi, qi, ki: (bi, ki, gi)),
                pl.BlockSpec((None, tk, gdh),
                             lambda bi, gi, qi, ki: (bi, ki, v_off + gi)),
            ],
            out_specs=pl.BlockSpec((None, tq, gdh),
                                   lambda bi, gi, qi, ki: (bi, qi, gi)),
            scratch_shapes=[
                pltpu.VMEM((G, tq, 1), jnp.float32),   # running max
                pltpu.VMEM((G, tq, 1), jnp.float32),   # running denominator
                pltpu.VMEM((G, tq, dh), jnp.float32),  # running accumulator
            ],
        ),
        compiler_params=pltpu.CompilerParams(
            dimension_semantics=("parallel", "parallel", "parallel", "arbitrary"),
            vmem_limit_bytes=_VMEM_LIMIT,
        ),
        cost_estimate=cost,
    )(q, k_in, v_in)


# ----------------------------- module wrapper --------------------------------


class CrossAttentionPallas:
    """Mirror of the PyTorch CrossAttention module (eval mode, dropout=0)."""

    def __init__(self, query_dim, context_dim=None, heads=8, dim_head=64, key=None):
        self.heads = max(1, heads)
        self.dim_head = max(32, dim_head)
        self.inner_dim = self.heads * self.dim_head
        self.query_dim = query_dim
        self.context_dim = query_dim if context_dim is None else context_dim
        self.scale = self.dim_head ** (-0.5)

        if key is None:
            key = jax.random.PRNGKey(0)
        k1, k2, k3, k4, k5 = jax.random.split(key, 5)

        def init_w(k, in_f, out_f):
            bound = 1.0 / (in_f ** 0.5)
            return jax.random.uniform(k, (in_f, out_f), jnp.float32,
                                      minval=-bound, maxval=bound)

        # Weights pre-transposed (in_features, out_features), stored in bf16 so
        # the MXU always sees bf16 operands.  Attention scale is folded into w_q.
        self.w_q = (init_w(k1, query_dim, self.inner_dim)
                    * self.scale).astype(jnp.bfloat16)
        # Fused K/V projection weight: (context_dim, 2*inner_dim).
        self.w_kv = jnp.concatenate(
            [init_w(k2, self.context_dim, self.inner_dim),
             init_w(k3, self.context_dim, self.inner_dim)], axis=1
        ).astype(jnp.bfloat16)
        self.w_o = init_w(k4, self.inner_dim, query_dim).astype(jnp.bfloat16)
        bound_o = 1.0 / (self.inner_dim ** 0.5)
        self.b_o = jax.random.uniform(k5, (query_dim,), jnp.float32,
                                      minval=-bound_o, maxval=bound_o)

    def __call__(self, x, context=None, mask=None):
        # TODO(synk): mask path (masked_fill before softmax) not implemented.
        if mask is not None:
            raise NotImplementedError("mask is not supported")
        b, n, d = x.shape
        ctx = x if context is None else context
        bc, m, dc = ctx.shape
        assert bc == b, "context batch must match query batch"

        # Projections (bf16 activations), no bias; K and V fused in one matmul.
        q = pallas_linear(x.reshape(b * n, d), self.w_q,
                          out_dtype=jnp.bfloat16).reshape(b, n, self.inner_dim)
        kv = pallas_linear(ctx.reshape(b * m, dc), self.w_kv,
                           out_dtype=jnp.bfloat16).reshape(b, m, 2 * self.inner_dim)

        # Attention directly in (b, seq, h*dh) layout: heads are selected via
        # BlockSpec index maps (no head split/merge transposes through HBM).
        out = pallas_cross_attention(q, kv, heads=self.heads,
                                     dim_head=self.dim_head)   # (b, n, inner) bf16

        out = pallas_linear(out.reshape(b * n, self.inner_dim), self.w_o,
                            self.b_o, out_dtype=x.dtype)
        return out.reshape(b, n, self.query_dim)


# ----------------------------- reference check ------------------------------


def reference_forward(mod: CrossAttentionPallas, x, context=None):
    h, dh = mod.heads, mod.dim_head
    b, n, _ = x.shape
    ctx = x if context is None else context
    w_q = mod.w_q.astype(jnp.float32)    # scale already folded into w_q
    w_kv = mod.w_kv.astype(jnp.float32)
    w_o = mod.w_o.astype(jnp.float32)

    q = x.astype(jnp.float32) @ w_q
    kv = ctx.astype(jnp.float32) @ w_kv
    k = kv[..., :mod.inner_dim]
    v = kv[..., mod.inner_dim:]

    def split(t):
        return t.reshape(b, t.shape[1], h, dh).transpose(0, 2, 1, 3)

    q, k, v = split(q), split(k), split(v)
    sim = jnp.einsum("bhid,bhjd->bhij", q, k)
    attn = jax.nn.softmax(sim, axis=-1)
    out = jnp.einsum("bhij,bhjd->bhid", attn, v)
    out = out.transpose(0, 2, 1, 3).reshape(b, n, h * dh)
    return out @ w_o + mod.b_o


if __name__ == "__main__":
    key = jax.random.PRNGKey(0)
    kx, kc, kp, kx2, kc2, kp2 = jax.random.split(key, 6)

    def check(got, want, name, tol=5e-2):
        assert got.shape == want.shape, name
        ok = bool(jnp.allclose(got.astype(jnp.float32), want, atol=tol, rtol=tol))
        assert ok, f"{name}: mismatch (max abs err "\
                   f"{float(jnp.max(jnp.abs(got.astype(jnp.float32) - want)))})"

    # Small cross-attention: full-extent tiles, non-lane-aligned head fallback,
    # single-KV-tile softmax path.
    b, n, qd = 2, 8, 32
    m, cd = 8, 32
    x = jax.random.normal(kx, (b, n, qd), jnp.float32)
    ctx = jax.random.normal(kc, (b, m, cd), jnp.float32)
    mod = CrossAttentionPallas(qd, context_dim=cd, heads=2, dim_head=32, key=kp)
    out = jax.block_until_ready(mod(x, ctx))
    check(out, reference_forward(mod, x, ctx), "small cross-attn")

    # Medium self-attention: multi-tile grids, fused-KV head groups (G=2),
    # multi-KV-step online softmax, >512-row padded-free linear tiling.
    b2, n2, qd2 = 2, 512, 128
    x2 = jax.random.normal(kx2, (b2, n2, qd2), jnp.float32)
    mod2 = CrossAttentionPallas(qd2, heads=4, dim_head=64, key=kp2)
    out2 = jax.block_until_ready(mod2(x2))
    check(out2, reference_forward(mod2, x2), "self-attn")

    # Medium cross-attention with a CLIP-like 77-token context: single KV tile,
    # fused-KV head-group indexing, non-multiple-of-8 rows in the KV projection.
    m2, cd2 = 77, 128
    c2 = jax.random.normal(kc2, (b2, m2, cd2), jnp.float32)
    out3 = jax.block_until_ready(mod2(x2, c2))
    check(out3, reference_forward(mod2, x2, c2), "cross-attn")

    print("KERNEL_OK")
</pallas_src>

<mosaic_0001>
module attributes {stable_mosaic.version = 11 : i64} {
  func.func @_matmul_kernel(%arg0: i32, %arg1: i32, %arg2: i32, %arg3: memref<16x32xf32, #tpu.memory_space<vmem>>, %arg4: memref<32x64xbf16, #tpu.memory_space<vmem>>, %arg5: memref<16x64xbf16, #tpu.memory_space<vmem>>, %arg6: memref<16x64xf32, #tpu.memory_space<vmem>>) attributes {dimension_semantics = [#tpu.dimension_semantics<parallel>, #tpu.dimension_semantics<parallel>, #tpu.dimension_semantics<arbitrary>], iteration_bounds = array<i64: 1, 1, 1>, scalar_prefetch = 0 : i64, scratch_operands = 1 : i64, tpu.core_type = #tpu.core_type<tc>, window_params = [{transform_indices = @transform_0, window_bounds = array<i64: 16, 32>}, {transform_indices = @transform_1, window_bounds = array<i64: 32, 64>}, {transform_indices = @transform_2, window_bounds = array<i64: 16, 64>}]} {
    %c0_i32 = arith.constant 0 : i32
    %0 = arith.cmpi eq, %arg2, %c0_i32 : i32
    %1 = arith.extui %0 : i1 to i32
    %c0_i32_0 = arith.constant 0 : i32
    %2 = arith.cmpi ne, %1, %c0_i32_0 : i32
    scf.if %2 {
      %cst_10 = arith.constant 0.000000e+00 : f32
      %13 = vector.broadcast %cst_10 : f32 to vector<16x64xf32>
      %c0_11 = arith.constant 0 : index
      %c0_12 = arith.constant 0 : index
      %14 = vector.load %arg6[%c0_11, %c0_12] : memref<16x64xf32, #tpu.memory_space<vmem>>, vector<16x64xf32>
      tpu.vector_store %arg6[%c0_11, %c0_12], %13 {strides = array<i32>} : memref<16x64xf32, #tpu.memory_space<vmem>>, vector<16x64xf32>,
    } else {
    }
    %c0 = arith.constant 0 : index
    %c0_1 = arith.constant 0 : index
    %3 = vector.load %arg6[%c0, %c0_1] : memref<16x64xf32, #tpu.memory_space<vmem>>, vector<16x64xf32>
    %c0_2 = arith.constant 0 : index
    %c0_3 = arith.constant 0 : index
    %4 = vector.load %arg3[%c0_2, %c0_3] : memref<16x32xf32, #tpu.memory_space<vmem>>, vector<16x32xf32>
    %5 = arith.truncf %4 : vector<16x32xf32> to vector<16x32xbf16>
    %c0_4 = arith.constant 0 : index
    %c0_5 = arith.constant 0 : index
    %6 = vector.load %arg4[%c0_4, %c0_5] : memref<32x64xbf16, #tpu.memory_space<vmem>>, vector<32x64xbf16>
    %cst = arith.constant dense<0.000000e+00> : vector<16x64xf32>
    %7 = tpu.matmul %5, %6, %cst {dimension_numbers = #tpu.dot_dimension_numbers<[1], [0], [0], [1], [0, 0, 1, 1], [], []>} : vector<16x32xbf16>, vector<32x64xbf16>, vector<16x64xf32> -> vector<16x64xf32>
    %8 = arith.addf %3, %7 : vector<16x64xf32>
    %c0_6 = arith.constant 0 : index
    %c0_7 = arith.constant 0 : index
    %9 = vector.load %arg6[%c0_6, %c0_7] : memref<16x64xf32, #tpu.memory_space<vmem>>, vector<16x64xf32>
    tpu.vector_store %arg6[%c0_6, %c0_7], %8 {strides = array<i32>} : memref<16x64xf32, #tpu.memory_space<vmem>>, vector<16x64xf32>,
    %c0_i32_8 = arith.constant 0 : i32
    %10 = arith.cmpi eq, %arg2, %c0_i32_8 : i32
    %11 = arith.extui %10 : i1 to i32
    %c0_i32_9 = arith.constant 0 : i32
    %12 = arith.cmpi ne, %11, %c0_i32_9 : i32
    scf.if %12 {
      %c0_10 = arith.constant 0 : index
      %c0_11 = arith.constant 0 : index
      %13 = vector.load %arg6[%c0_10, %c0_11] : memref<16x64xf32, #tpu.memory_space<vmem>>, vector<16x64xf32>
      %14 = arith.truncf %13 : vector<16x64xf32> to vector<16x64xbf16>
      %c0_12 = arith.constant 0 : index
      %c0_13 = arith.constant 0 : index
      %15 = vector.load %arg5[%c0_12, %c0_13] : memref<16x64xbf16, #tpu.memory_space<vmem>>, vector<16x64xbf16>
      tpu.vector_store %arg5[%c0_12, %c0_13], %14 {strides = array<i32>} : memref<16x64xbf16, #tpu.memory_space<vmem>>, vector<16x64xbf16>,
    } else {
    }
    return
  }
  func.func @transform_0(%arg0: i32, %arg1: i32, %arg2: i32) -> (i32, i32) {
    %c0_i32 = arith.constant 0 : i32
    return %arg0, %arg2 : i32, i32
  }
  func.func @transform_1(%arg0: i32, %arg1: i32, %arg2: i32) -> (i32, i32) {
    %c0_i32 = arith.constant 0 : i32
    return %arg2, %arg1 : i32, i32
  }
  func.func @transform_2(%arg0: i32, %arg1: i32, %arg2: i32) -> (i32, i32) {
    %c0_i32 = arith.constant 0 : i32
    return %arg0, %arg1 : i32, i32
  }
}

</mosaic_0001>

<bundles_post_ra>
// kernel: tpu_custom_call.1
= control target key start
LH: loop header
LB: loop body
LE: loop exit
PB: predicated region body
PF: predicated region fallthrough
CT: control target
= control target key end

     0   :  { %7 = vsyncpa [#allocation4], 0  ;;  %s265_s0 = inlined_call_operand.hbm [shape: f32[16,32], index: 0, kind: input, shape index: {}]   ;;  %s266_s1 = inlined_call_operand.hbm [shape: bf16[32,64], index: 1, kind: input, shape index: {}]   ;;  %s267_s2 = inlined_call_operand.hbm [shape: bf16[16,64], index: 2, kind: output, shape index: {}]  }
   0x1   :  { %8 = vsyncpa [#allocation7], 0 }
   0x2   :  { %9 = vsyncpa [#allocation5], 0  ;;  %s14_s11 = sshll.u32 %s265_s0, 4  ;;  %s223_s12 = smov [#allocation3]   ;;  %s15_s11 = int_to_ptr.hbm [resolvable:$true] %s14_s11 }
   0x3   :  { %s16_s13 = sshll.u32 %s223_s12, 4  ;;  %s27_s16 = sshll.u32 %s266_s1, 4  ;;  %s17_s13 = int_to_ptr.vmem [resolvable:$true] %s16_s13  ;;  %s28_s16 = int_to_ptr.hbm [resolvable:$true] %s27_s16 }
   0x4   :  { %s224_s17 = smov 128   ;;  %s225_s18 = smov 8  }
   0x5   :  { %22 = dma.hbm_to_vmem [thread:$0]  %s15_s11, 256, %s17_s13, [#allocation4], %s224_s17, %s224_s17, %s225_s18  }
   0x6   :  { %s226_s19 = smov [#allocation6]   ;;  %s227_s21 = smov 64  }
   0x7   :  { %s29_s20 = sshll.u32 %s226_s19, 4  ;;  %s228_s22 = smov 4   ;;  %s30_s20 = int_to_ptr.vmem [resolvable:$true] %s29_s20 }
   0x8   :  { %35 = dma.hbm_to_vmem [thread:$0]  %s28_s16, 256, %s30_s20, [#allocation7], %s227_s21, %s227_s21, %s228_s22  }
   0x9   :  { %217 = dma.done.wait [#allocation4], 256  }
   0xa   :  { %218 = vsyncadd [#allocation4], 4294967040 }
   0xb   :  { %219 = dma.done.wait [#allocation7], 256  }
   0xc   :  { %220 = vsyncadd [#allocation7], 4294967040  ;;  %vm49_vm0 = vcmask 523264   ;;  %v229_v0 = vmov 0.0   ;;  %v136_v1 = vld [vmem:[#allocation6 + $0x8] sm:$0xff]  ;;  %v135_v2 = vld [vmem:[#allocation6] sm:$0xff] }
   0xd   :  { %50 = vst.msk [vmem:[#allocation2] sm:$0xff] %vm49_vm0, %v229_v0  ;;  %83 = vmatpush.bf16.msra.mxu0 %v136_v1  ;;  %v54_v3 = vld [vmem:[#allocation3] sm:$0xff]  ;;  %v55_v4 = vld [vmem:[#allocation3 + $0x8] sm:$0xff]  ;;  %vm73_vm1 = vcmask 261120   ;;  %vm103_vm2 = vcmask 519168   ;;  %s230_s0 = smov [#allocation8]  }
   0xe   :  { %51 = vst.msk [vmem:[#allocation2 + $0x8] sm:$0xff] %vm49_vm0, %v229_v0  ;;  %v56_v5 = vpack.c.bf16 %v55_v4, %v54_v3  ;;  %s110_s1 = sshll.u32 %s230_s0, 4  ;;  %s112_s25 = sshll.u32 %s267_s2, 4  ;;  %s111_s1 = int_to_ptr.vmem [resolvable:$true] %s110_s1  ;;  %s113_s25 = int_to_ptr.hbm [resolvable:$true] %s112_s25 }
  0x11   :  { %84 = vmatpush.bf16.msra.mxu0 %v135_v2 }
  0x14   :  { %134 = vmatmul.msk.bf16.vlgmr.msra.gmra.mxu0 %vm73_vm1, %v56_v5  ;;  %v52_v6 = vld [vmem:[#allocation2] sm:$0xff] }
  0x15   :  { %v53_v9 = vld [vmem:[#allocation2 + $0x8] sm:$0xff] }
  0x91   :  { %v86_v7 = vpop.f32.mrf.mxu0 }
  0x92   :  { %v91_v8 = vadd.f32 %v86_v7, %v52_v6 }
  0x94   :  { %94 = vst.msk [vmem:[#allocation2] sm:$0xff] %vm49_vm0, %v91_v8 }
  0x99   :  { %v88_v10 = vpop.f32.mrf.mxu0 }
  0x9a   :  { %v92_v11 = vadd.f32 %v88_v10, %v53_v9 }
  0x9b   :  { %v99_v12 = vld [vmem:[#allocation2] sm:$0xff] }
  0x9c   :  { %95 = vst.msk [vmem:[#allocation2 + $0x8] sm:$0xff] %vm49_vm0, %v92_v11  ;;  %v101_v13 = vpack.c.bf16 %v99_v12, %v99_v12 }
  0x9e   :  { %104 = vst.msk [vmem:[#allocation8] sm:$0xf] %vm103_vm2, %v101_v13 }
  0xa3   :  { %v100_v14 = vld [vmem:[#allocation2 + $0x8] sm:$0xff] }
  0xa4   :  { %v102_v15 = vpack.c.bf16 %v100_v14, %v100_v14 }
  0xa6   :  { %105 = vst.msk [vmem:[#allocation8 + $0x4] sm:$0xf] %vm103_vm2, %v102_v15 }
  0xa7   :  { %118 = dma.vmem_to_hbm [thread:$0]  %s111_s1, 128, %s113_s25, [#allocation5], %s227_s21, %s227_s21, %s228_s22  }
  0xa8   :  { %221 = dma.done.wait [#allocation5], 128  }
  0xa9   :  { %222 = vsyncadd [#allocation5], 4294967168 }
  0xaa   :  { %123 = vsyncpa [#allocation4], 1 }
  0xab   :  { %124 = vsyncpa [#allocation7], 1 }
  0xac   :  { %125 = vsyncpa [#allocation5], 1 }

</bundles_post_ra>
